<compile_context>
chip_gen: v7x
topology: tpu7x:2x2x1
jax: 0.10.0
libtpu: 0.0.40
codegen_flags: <defaults>
</compile_context>

<pallas_src>
import functools

import jax
import jax.numpy as jnp
from jax.experimental import pallas as pl
from jax.experimental.pallas import tpu as pltpu


# ---------------------------------------------------------------------------
# Kernels
# ---------------------------------------------------------------------------

def eca_fused_kernel(w_ref, x_ref, o_ref, pad_ref, *, inv_hw):
    """Single-pass ECA for one batch element: pool + conv + sigmoid + scale.

    w_ref:   SMEM f32[3]        conv1d weight (k=3, no bias)
    x_ref:   VMEM (1, C, HW)    full spatial slab of one batch element
    o_ref:   VMEM (1, C, HW)    output slab (same dtype as x)
    pad_ref: VMEM (C+2, 1) f32  zero-padded pooled vector for the k=3 conv
    """
    C = x_ref.shape[1]
    # Global average pool: reduce lanes, keep C-on-sublanes layout.
    pooled = jnp.sum(x_ref[0].astype(jnp.float32), axis=-1,
                     keepdims=True) * inv_hw                     # (C, 1)
    # Zero-padded pooled vector: rows 0 and C+1 stay zero -> conv padding=1.
    pad_ref[...] = jnp.zeros_like(pad_ref)
    pad_ref[pl.ds(1, C), :] = pooled
    w0 = w_ref[0]
    w1 = w_ref[1]
    w2 = w_ref[2]
    y = (w0 * pad_ref[pl.ds(0, C), :]
         + w1 * pad_ref[pl.ds(1, C), :]
         + w2 * pad_ref[pl.ds(2, C), :])                         # (C, 1) f32
    gate = jax.nn.sigmoid(y).astype(o_ref.dtype)                 # (C, 1)
    # Lane-broadcast multiply in x's dtype; re-reads the VMEM block (cheap).
    o_ref[0] = x_ref[0] * gate


def eca_pool_kernel(x_ref, psum_ref, acc_ref, *, hw, tile, needs_mask):
    """Two-pass path, pass 1: partial per-channel spatial sums.

    Grid (N, P, tiles_per_part); the last axis is the reduction ("arbitrary"),
    the P axis splits HW into parallel partitions (useful on v7x when N == 1).

    x_ref:    VMEM (1, C, T)      one spatial tile
    psum_ref: VMEM (1, 1, C, 1)   f32 partial sum for this (n, p) partition
    acc_ref:  VMEM (C, 1)         f32 running sum (resident across the t axis)
    """
    p = pl.program_id(1)
    t = pl.program_id(2)
    tpp = pl.num_programs(2)

    @pl.when(t == 0)
    def _init():
        acc_ref[...] = jnp.zeros_like(acc_ref)

    xt = x_ref[0].astype(jnp.float32)                            # (C, T)
    if needs_mask:
        # The tiled extent overshoots HW: zero out-of-range lanes before the
        # reduction (out-of-bounds VMEM contents are undefined).
        lane = jax.lax.broadcasted_iota(jnp.int32, xt.shape, 1)
        gidx = (p * tpp + t) * tile + lane
        xt = jnp.where(gidx < hw, xt, 0.0)
    acc_ref[...] += jnp.sum(xt, axis=-1, keepdims=True)

    @pl.when(t == tpp - 1)
    def _write():
        psum_ref[0, 0] = acc_ref[...]


def eca_scale_kernel(g_ref, x_ref, o_ref):
    """Two-pass path, pass 2: lane-dense elementwise scale by the gate."""
    # g_ref: (1, C, 1) f32 gate; x_ref/o_ref: (1, C, T) in x's dtype.
    o_ref[...] = x_ref[...] * g_ref[...].astype(x_ref.dtype)


# ---------------------------------------------------------------------------
# Wrapper helpers
# ---------------------------------------------------------------------------

def _vmem_budget_bytes():
    """Physical VMEM of the running chip minus headroom (v7x: 64 MiB/TC)."""
    try:
        cap = int(pltpu.get_tpu_info().vmem_capacity_bytes)
    except Exception:
        cap = 64 * 1024 * 1024          # conservative default (v7x)
    return max(32 * 1024 * 1024, cap - 8 * 1024 * 1024)


def _pick_hw_tile(hw, c, itemsize):
    """Lane tile for the two-pass path: multiple of 128, ~2 MiB per block."""
    target = 2 * 1024 * 1024
    lanes = max(128, ((target // max(1, c * itemsize)) // 128) * 128)
    if hw <= 128 or hw <= lanes:
        return hw                        # one full-row tile (full-dim block)
    if hw % 128 == 0:
        # Largest multiple-of-128 divisor within the byte budget (no masking).
        best = 128
        for cand in range(128, min(hw, lanes) + 1, 128):
            if hw % cand == 0:
                best = cand
        return best
    # No clean divisor: cdiv grid + masked tail lanes in the pool kernel.
    return lanes


# ---------------------------------------------------------------------------
# Forward pass
# ---------------------------------------------------------------------------

@functools.partial(jax.jit, static_argnames=("force_two_pass", "tile_override"))
def eca_forward(x, weight, *, force_two_pass=False, tile_override=None):
    """x: (N, C, H, W), weight: (3,) conv1d kernel -> (N, C, H, W)."""
    N, C, H, W = x.shape
    HW = H * W
    itemsize = jnp.dtype(x.dtype).itemsize
    inv_hw = 1.0 / float(HW)
    x3 = x.reshape(N, C, HW)
    weight = weight.astype(jnp.float32)

    vmem_budget = _vmem_budget_bytes()
    slab_bytes = C * HW * itemsize

    use_fused = (not force_two_pass) and (
        4 * slab_bytes + (2 << 20) <= vmem_budget)

    if use_fused:
        # ---------------- Fused single-pass path: read once, write once.
        vmem_limit = int(min(vmem_budget,
                             max(32 << 20, 4 * slab_bytes + (2 << 20))))
        cost = pl.CostEstimate(
            flops=int(3 * N * C * HW),
            transcendentals=int(N * C),
            bytes_accessed=int(2 * N * C * HW * itemsize))
        out3 = pl.pallas_call(
            functools.partial(eca_fused_kernel, inv_hw=inv_hw),
            out_shape=jax.ShapeDtypeStruct((N, C, HW), x.dtype),
            grid_spec=pltpu.PrefetchScalarGridSpec(
                num_scalar_prefetch=0,
                grid=(N,),
                in_specs=[
                    pl.BlockSpec(memory_space=pltpu.MemorySpace.SMEM),  # w
                    pl.BlockSpec((1, C, HW), lambda n: (n, 0, 0)),      # x
                ],
                out_specs=pl.BlockSpec((1, C, HW), lambda n: (n, 0, 0)),
                scratch_shapes=[pltpu.VMEM((C + 2, 1), jnp.float32)],
            ),
            input_output_aliases={1: 0},
            compiler_params=pltpu.CompilerParams(
                dimension_semantics=("parallel",),
                vmem_limit_bytes=vmem_limit),
            cost_estimate=cost,
        )(weight, x3)
        return out3.reshape(N, C, H, W)

    # ---------------- Two-pass fallback: tiled pool, then tiled scale.
    T = int(tile_override) if tile_override is not None else _pick_hw_tile(
        HW, C, itemsize)
    n_tiles = (HW + T - 1) // T
    # Extra parallel HW partition so both v7x TensorCores stream when N == 1.
    P = 2 if (N == 1 and n_tiles % 2 == 0 and n_tiles >= 2) else 1
    tpp = n_tiles // P
    needs_mask = (n_tiles * T != HW)

    tile_bytes = C * T * itemsize
    vmem_limit = int(min(vmem_budget,
                         max(32 << 20, 6 * tile_bytes + (2 << 20))))

    # Pass 1: partial per-channel spatial sums -> (N, P, C, 1) f32.
    pool_cost = pl.CostEstimate(
        flops=int(2 * N * C * HW),
        transcendentals=0,
        bytes_accessed=int(N * C * HW * itemsize + N * P * C * 4))
    psum = pl.pallas_call(
        functools.partial(eca_pool_kernel, hw=HW, tile=T,
                          needs_mask=needs_mask),
        out_shape=jax.ShapeDtypeStruct((N, P, C, 1), jnp.float32),
        grid_spec=pltpu.PrefetchScalarGridSpec(
            num_scalar_prefetch=0,
            grid=(N, P, tpp),
            in_specs=[
                pl.BlockSpec((1, C, T),
                             lambda n, p, t: (n, 0, p * tpp + t)),
            ],
            out_specs=pl.BlockSpec((1, 1, C, 1),
                                   lambda n, p, t: (n, p, 0, 0)),
            scratch_shapes=[pltpu.VMEM((C, 1), jnp.float32)],
        ),
        compiler_params=pltpu.CompilerParams(
            dimension_semantics=("parallel", "parallel", "arbitrary"),
            vmem_limit_bytes=vmem_limit),
        cost_estimate=pool_cost,
    )(x3)

    # Tiny (N, C) epilogue in plain JAX: mean, k=3 zero-padded conv, sigmoid.
    pooled = jnp.sum(psum, axis=1)[..., 0] * inv_hw              # (N, C)
    pad = jnp.pad(pooled, ((0, 0), (1, 1)))
    y = (weight[0] * pad[:, 0:C]
         + weight[1] * pad[:, 1:C + 1]
         + weight[2] * pad[:, 2:C + 2])
    gate3 = jax.nn.sigmoid(y)[:, :, None]                        # (N, C, 1)

    # Pass 2: lane-dense elementwise scale; x aliased in-place to the output.
    scale_cost = pl.CostEstimate(
        flops=int(N * C * HW),
        transcendentals=0,
        bytes_accessed=int(2 * N * C * HW * itemsize + N * C * 4))
    out3 = pl.pallas_call(
        eca_scale_kernel,
        out_shape=jax.ShapeDtypeStruct((N, C, HW), x.dtype),
        grid_spec=pltpu.PrefetchScalarGridSpec(
            num_scalar_prefetch=0,
            grid=(N, n_tiles),
            in_specs=[
                pl.BlockSpec((1, C, 1), lambda n, t: (n, 0, 0)),   # gate
                pl.BlockSpec((1, C, T), lambda n, t: (n, 0, t)),   # x tile
            ],
            out_specs=pl.BlockSpec((1, C, T), lambda n, t: (n, 0, t)),
        ),
        input_output_aliases={1: 0},
        compiler_params=pltpu.CompilerParams(
            dimension_semantics=("parallel", "parallel"),
            vmem_limit_bytes=vmem_limit),
        cost_estimate=scale_cost,
    )(gate3, x3)

    return out3.reshape(N, C, H, W)


# ---------------------------------------------------------------------------
# Pure-JAX reference (matches PyTorch ECA.forward with k_size=3)
# ---------------------------------------------------------------------------

def eca_reference(x, weight):
    p = jnp.mean(x.astype(jnp.float32), axis=(2, 3))             # (N, C)
    C = x.shape[1]
    p_pad = jnp.pad(p, ((0, 0), (1, 1)))
    y = (weight[0] * p_pad[:, 0:C]
         + weight[1] * p_pad[:, 1:C + 1]
         + weight[2] * p_pad[:, 2:C + 2])
    scale = jax.nn.sigmoid(y)[:, :, None, None]
    return (x * scale.astype(x.dtype)).astype(x.dtype)


if __name__ == "__main__":
    key = jax.random.PRNGKey(0)
    kx, kw, kx2 = jax.random.split(key, 3)

    # Conv1d(1, 1, k=3, bias=False) weight, kaiming-uniform-style init.
    k_size = 3
    bound = 1.0 / (k_size ** 0.5)
    weight = jax.random.uniform(kw, (k_size,), dtype=jnp.float32,
                                minval=-bound, maxval=bound)

    # Case 1: fused single-pass path (small slab fits VMEM).
    N, C, H, W = 2, 4, 16, 16
    x = jax.random.normal(kx, (N, C, H, W), dtype=jnp.float32)
    ref = eca_reference(x, weight)
    out = jax.block_until_ready(eca_forward(x, weight))
    assert out.shape == (N, C, H, W)
    assert jnp.allclose(out, ref, atol=1e-5, rtol=1e-5), "fused path mismatch"

    # Case 2: forced two-pass tiled path with non-128-divisible HW (20*20=400),
    # multi-tile masked reduction and the 2-way parallel HW split (N == 1).
    N2, C2, H2, W2 = 1, 8, 20, 20
    x2 = jax.random.normal(kx2, (N2, C2, H2, W2), dtype=jnp.float32)
    ref2 = eca_reference(x2, weight)
    out2 = jax.block_until_ready(
        eca_forward(x2, weight, force_two_pass=True, tile_override=128))
    assert out2.shape == (N2, C2, H2, W2)
    assert jnp.allclose(out2, ref2, atol=1e-5, rtol=1e-5), \
        "two-pass path mismatch"

    print("KERNEL_OK")
</pallas_src>

<mosaic_0001>
module attributes {stable_mosaic.version = 11 : i64} {
  func.func @eca_fused_kernel(%arg0: i32, %arg1: memref<3xf32, #tpu.memory_space<smem>>, %arg2: memref<1x4x256xf32, #tpu.memory_space<vmem>>, %arg3: memref<1x4x256xf32, #tpu.memory_space<vmem>>, %arg4: memref<6x1xf32, #tpu.memory_space<vmem>>) attributes {dimension_semantics = [#tpu.dimension_semantics<parallel>], iteration_bounds = array<i64: 2>, scalar_prefetch = 0 : i64, scratch_operands = 1 : i64, tpu.core_type = #tpu.core_type<tc>, window_params = [{transform_indices = @transform_0, window_bounds = array<i64: 3>}, {transform_indices = @transform_1, window_bounds = array<i64: 1, 4, 256>}, {transform_indices = @transform_2, window_bounds = array<i64: 1, 4, 256>}]} {
    %c0 = arith.constant 0 : index
    %c0_0 = arith.constant 0 : index
    %c0_1 = arith.constant 0 : index
    %0 = vector.load %arg2[%c0, %c0_0, %c0_1] : memref<1x4x256xf32, #tpu.memory_space<vmem>>, vector<1x4x256xf32>
    %1 = vector.shape_cast %0 : vector<1x4x256xf32> to vector<4x256xf32>
    %cst = arith.constant dense<0.000000e+00> : vector<4xf32>
    %2 = vector.multi_reduction <add>, %1, %cst [1] : vector<4x256xf32> to vector<4xf32>
    %3 = vector.shape_cast %2 : vector<4xf32> to vector<4x1xf32>
    %cst_2 = arith.constant 3.906250e-03 : f32
    %4 = vector.broadcast %cst_2 : f32 to vector<4x1xf32>
    %5 = arith.mulf %3, %4 : vector<4x1xf32>
    %cst_3 = arith.constant 0.000000e+00 : f32
    %6 = vector.broadcast %cst_3 : f32 to vector<6x1xf32>
    %c0_4 = arith.constant 0 : index
    %c0_5 = arith.constant 0 : index
    %7 = vector.load %arg4[%c0_4, %c0_5] : memref<6x1xf32, #tpu.memory_space<vmem>>, vector<6x1xf32>
    tpu.vector_store %arg4[%c0_4, %c0_5], %6 {strides = array<i32>} : memref<6x1xf32, #tpu.memory_space<vmem>>, vector<6x1xf32>,
    %c1 = arith.constant 1 : index
    %c0_6 = arith.constant 0 : index
    %8 = vector.load %arg4[%c1, %c0_6] : memref<6x1xf32, #tpu.memory_space<vmem>>, vector<4x1xf32>
    tpu.vector_store %arg4[%c1, %c0_6], %5 {strides = array<i32>} : memref<6x1xf32, #tpu.memory_space<vmem>>, vector<4x1xf32>,
    %c0_7 = arith.constant 0 : index
    %9 = memref.load %arg1[%c0_7] : memref<3xf32, #tpu.memory_space<smem>>
    %c1_8 = arith.constant 1 : index
    %10 = memref.load %arg1[%c1_8] : memref<3xf32, #tpu.memory_space<smem>>
    %c2 = arith.constant 2 : index
    %11 = memref.load %arg1[%c2] : memref<3xf32, #tpu.memory_space<smem>>
    %c0_9 = arith.constant 0 : index
    %c0_10 = arith.constant 0 : index
    %12 = vector.load %arg4[%c0_9, %c0_10] : memref<6x1xf32, #tpu.memory_space<vmem>>, vector<4x1xf32>
    %13 = vector.broadcast %9 : f32 to vector<4x1xf32>
    %14 = arith.mulf %13, %12 : vector<4x1xf32>
    %c1_11 = arith.constant 1 : index
    %c0_12 = arith.constant 0 : index
    %15 = vector.load %arg4[%c1_11, %c0_12] : memref<6x1xf32, #tpu.memory_space<vmem>>, vector<4x1xf32>
    %16 = vector.broadcast %10 : f32 to vector<4x1xf32>
    %17 = arith.mulf %16, %15 : vector<4x1xf32>
    %18 = arith.addf %14, %17 : vector<4x1xf32>
    %c2_13 = arith.constant 2 : index
    %c0_14 = arith.constant 0 : index
    %19 = vector.load %arg4[%c2_13, %c0_14] : memref<6x1xf32, #tpu.memory_space<vmem>>, vector<4x1xf32>
    %20 = vector.broadcast %11 : f32 to vector<4x1xf32>
    %21 = arith.mulf %20, %19 : vector<4x1xf32>
    %22 = arith.addf %18, %21 : vector<4x1xf32>
    %23 = arith.negf %22 : vector<4x1xf32>
    %24 = math.exp %23 : vector<4x1xf32>
    %cst_15 = arith.constant 1.000000e+00 : f32
    %25 = vector.broadcast %cst_15 : f32 to vector<4x1xf32>
    %26 = arith.addf %25, %24 : vector<4x1xf32>
    %27 = arith.divf %25, %26 : vector<4x1xf32>
    %c0_16 = arith.constant 0 : index
    %c0_17 = arith.constant 0 : index
    %c0_18 = arith.constant 0 : index
    %28 = vector.load %arg2[%c0_16, %c0_17, %c0_18] : memref<1x4x256xf32, #tpu.memory_space<vmem>>, vector<1x4x256xf32>
    %29 = vector.shape_cast %28 : vector<1x4x256xf32> to vector<4x256xf32>
    %30 = vector.broadcast %27 : vector<4x1xf32> to vector<4x256xf32>
    %31 = arith.mulf %29, %30 : vector<4x256xf32>
    %c0_19 = arith.constant 0 : index
    %c0_20 = arith.constant 0 : index
    %c0_21 = arith.constant 0 : index
    %32 = vector.load %arg3[%c0_19, %c0_20, %c0_21] : memref<1x4x256xf32, #tpu.memory_space<vmem>>, vector<1x4x256xf32>
    %33 = vector.shape_cast %32 : vector<1x4x256xf32> to vector<4x256xf32>
    %34 = vector.shape_cast %31 : vector<4x256xf32> to vector<1x4x256xf32>
    tpu.vector_store %arg3[%c0_19, %c0_20, %c0_21], %34 {strides = array<i32>} : memref<1x4x256xf32, #tpu.memory_space<vmem>>, vector<1x4x256xf32>,
    return
  }
  func.func @transform_0(%arg0: i32) -> i32 {
    %c0_i32 = arith.constant 0 : i32
    %c0_i32_0 = arith.constant 0 : i32
    return %c0_i32 : i32
  }
  func.func @transform_1(%arg0: i32) -> (i32, i32, i32) {
    %c0_i32 = arith.constant 0 : i32
    %c0_i32_0 = arith.constant 0 : i32
    %c0_i32_1 = arith.constant 0 : i32
    return %arg0, %c0_i32, %c0_i32_0 : i32, i32, i32
  }
  func.func @transform_2(%arg0: i32) -> (i32, i32, i32) {
    %c0_i32 = arith.constant 0 : i32
    %c0_i32_0 = arith.constant 0 : i32
    %c0_i32_1 = arith.constant 0 : i32
    return %arg0, %c0_i32, %c0_i32_0 : i32, i32, i32
  }
}

</mosaic_0001>

<bundles_post_ra>
// kernel: eca_forward.1
= control target key start
LH: loop header
LB: loop body
LE: loop exit
PB: predicated region body
PF: predicated region fallthrough
CT: control target
= control target key end

     0   :  { %7 = vsyncpa [#allocation4], 0  ;;  %s367_s9 = smov 0   ;;  %s405_s0 = inlined_call_operand.vmem [shape: f32[3], index: 0, kind: input, shape index: {}]   ;;  %s406_s1 = inlined_call_operand.vmem [shape: f32[2,4,256], index: 1, kind: input, shape index: {}, may-alias: {1,2}]   ;;  %s407_s2 = inlined_call_operand.vmem [shape: f32[2,4,256], index: 2, kind: output, shape index: {}, may-alias: {1,2}]  }
   0x1 LB: > { %s275_s10 = sadd.s32 4294967295, %s346_s9   ;;  %p277_p0 = scmp.ge.s32.totalorder %s346_s9, 1  ;;  %s346_s9 = sphi %s367_s9, %s13_s9  }
   0x2   : > { %p91_p1 = scmp.lt.s32.totalorder %s346_s9, 3  ;;  %s104_s13 = sshll.u32 %s405_s0, 4  ;;  %s105_s13 = int_to_ptr.vmem [resolvable:$true] %s104_s13 }
   0x3   : > { %p301_p3 = scmp.eq.s32.totalorder %s275_s10, 0  ;;  %s321_s15 = scalar_lea.vmem %s105_s13, 16 }
   0x4   : > { %p378_p2 = pnand %p277_p0, %p91_p1  ;;  %p322_p6 = scmp.ne.s32.totalorder %s105_s13, %s321_s15 }
   0x5   : > { %p329_p10 = scmp.lt.s32.totalorder %s105_s13, %s105_s13  ;;  %p330_p11 = scmp.lt.s32.totalorder %s321_s15, %s321_s15 }
   0x6   : > { %p297_p4 = pneg %p378_p2 }
   0x7   : > { %p331_p12 = por %p330_p11, %p329_p10 }
   0x8   : > { %p298_p5 = pnand %p301_p3, %p297_p4 }
   0xa   : > { %p323_p7 = pneg %p298_p5 }
   0xc   : > { %p324_p8 = pnand %p323_p7, %p322_p6 }
   0xe   : > { %p325_p9 = pneg %p324_p8 }
  0x10   : > { %p332_p13 = pnand %p331_p12, %p325_p9 }
  0x12   : > { %335 = shalt.err (!%p332_p13)
}
  0x13   : > { %s348_s16 = smov [#allocation3]   ;;  %125 = sbr.rel (%p378_p2) target bundleno = 358 (0x166), region = 28 }
  0x14   : > { %300 = dma.vmem_to_smem (!%p298_p5), %s105_s13, 16, %s348_s16, [#allocation4]  }
  0x1a   : > { %341 = dma.done.wait (%p301_p3), [#allocation4], 16  }
  0x1b   : > { %343 = vsyncadd (%p301_p3), [#allocation4], 4294967280 }
  0x1c   : > { %131 = sfence }
  0x1d   : > { %p148_p0 = scmp.lt.s32.totalorder %s275_s10, 1  ;;  %vm169_vm0 = vcmask 5120   ;;  %v349_v0 = vmov 0.0   ;;  %vm162_vm1 = vcmask 1043456   ;;  %v350_v6 = vmov 0   ;;  %s173_s21 = sld [smem:[#allocation3]] }
  0x1e   : > { %170 = vst.msk [vmem:[#allocation2] sm:$0x3f] %vm169_vm0, %v349_v0  ;;  %315 = vset.pattern.permute.xlu0 %v350_v6  ;;  %vm171_vm2 = vcmask 3072   ;;  %s286_s22 = sld [smem:[#allocation3 + $0x1]]  ;;  %s287_s23 = sld [smem:[#allocation3 + $0x2]]  ;;  %v201_v26 = vlaneseq }
  0x1f   : > { %s410_s10 = smov (!%p148_p0, %s275_s10), 1  ;;  %v351_v24 = vmov 839922192  }
  0x20   : > { %s291_s17 = sshll.u32 %s410_s10, 3  ;;  %v199_v25 = vunpack.c.l.s4 %v351_v24  ;;  %v202_v28 = vshrl.u32 %v201_v26, 7 }
  0x21   : > { %s152_s20 = scalar_lea.vmem %s406_s1, %s291_s17  ;;  %s157_s26 = scalar_lea.vmem %s407_s2, %s291_s17 }
  0x22   : > { %v158_v1 = vld [vmem:[%s152_s20] sm:$0xff]  ;;  %v200_v27 = vunpack.c.0.s8 %v199_v25 }
  0x23   : > { %v160_v2 = vcombine.high %v158_v1, %v158_v1  ;;  %v163_v3 = vsel %vm162_vm1, %v158_v1, 0.0  ;;  %v177_v9 = vstv %s173_s21 }
  0x24   : > { %v180_v10 = vstv %s286_s22  ;;  %v184_v14 = vstv %s287_s23  ;;  %v203_v29 = vsub.s32 %v200_v27, %v202_v28 }
  0x25   : > { %v164_v4 = vsel %vm162_vm1, %v160_v2, 0.0 }
  0x26   : > { %v165_v5 = vadd.f32 %v164_v4, %v163_v3 }
  0x28   : > { %166 = vadd.xlane.f32.xlu0 %v165_v5 }
  0xb5   : > { %v167_v7 = vpop.xlane.xlu0 %166 }
  0xb6   : > { %v168_v8 = vmul.f32 0.00390625, %v167_v7 }
  0xb8   : > { %172 = vst.msk [vmem:[#allocation2 + $0x1] sm:$0xf] %vm171_vm2, %v168_v8 }
  0xbf   : > { %v176_v11 = vld [vmem:[#allocation2] sm:$0xf] }
  0xc0   : > { %v179_v12 = vld [vmem:[#allocation2 + $0x1] sm:$0xf]  ;;  %v178_v15 = vmul.f32 %v177_v9, %v176_v11 }
  0xc1   : > { %v183_v13 = vld [vmem:[#allocation2 + $0x2] sm:$0xf]  ;;  %v181_v16 = vmul.f32 %v180_v10, %v179_v12 }
  0xc2   : > { %v185_v18 = vmul.f32 %v184_v14, %v183_v13 }
  0xc3   : > { %v182_v17 = vadd.f32 %v181_v16, %v178_v15 }
  0xc5   : > { %v186_v19 = vadd.f32 %v185_v18, %v182_v17 }
  0xc7   : > { %v288_v20 = vmul.f32 -1.442695, %v186_v19 }
  0xc9   : > { %317 = vpow2.f32 %v288_v20 }
  0xd3   : > { %v318_v21 = vpop.eup %317 }
  0xd4   : > { %v190_v22 = vadd.f32 1.0, %v318_v21 }
  0xd6   : > { %319 = vrcp.f32 %v190_v22 }
  0xe0   : > { %v320_v23 = vpop.eup %319 }
  0xe1   : > { %196 = vperm.xlu0 %315, %v320_v23  }
 0x160   : > { %v197_v30 = vpop.permute.xlu0 %196 }
 0x161   : > { %v204_v31 = vrot.slane %v197_v30, %v203_v29 }
 0x163   : > { %v206_v32 = vmul.f32 %v204_v31, %v158_v1 }
 0x165   : > { %207 = vst [vmem:[%s157_s26] sm:$0xff] %v206_v32 }
 0x166 PF: > { %s13_s9 = sadd.s32 1, %s346_s9  }
 0x167   : > { %p10_p1 = scmp.ge.s32.totalorder %s13_s9, 4  }
 0x169   :  { %12 = sbr.rel (!%p10_p1) target bundleno = 1 (0x1), region = 63 }
 0x170   :  { %229 = vsyncpa [#allocation4], 1 }
 0x171   :  { %231 = vsyncpa [#allocation4 + $0x1], 1 }

</bundles_post_ra>
